<compile_context>
chip_gen: v5e
topology: v5e:2x2
jax: 0.10.0
libtpu: 0.0.40
codegen_flags: <defaults>
</compile_context>

<pallas_src>
import functools

import jax
import jax.numpy as jnp
from jax.experimental import pallas as pl
from jax.experimental.pallas import tpu as pltpu


def _eventually_kernel(x_ref, w_ref, o_ref):
    # x_ref: (Bb, T, Gb)  u[b, l, g]   (original x, regrouped)
    # w_ref: (T, Gb)      W[l, g]
    # o_ref: (Bb, Gb)
    u = x_ref[...]
    w = w_ref[...]
    e = jnp.log(1.0 - u * w[None, :, :])          # (Bb, T, Gb)  EUP log
    a = jnp.sum(e, axis=1)                        # (Bb, Gb)     sublane reduce
    # 1 - (-1 / (-1 + a)) == 1 + 1/(a - 1); exact reciprocal (EUP path).
    o_ref[...] = 1.0 + pl.reciprocal(a - 1.0)


def _pick_lane_block(G, max_lanes=512):
    if G <= 128:
        return G                                  # full dim allowed (< 128 ok)
    return min(max_lanes, (G // 128) * 128)       # multiple of 128


def _pick_batch_block(B, max_rows=256):
    if B <= max_rows:
        return B                                  # full dim
    return max_rows                               # multiple of 8


@functools.partial(jax.jit, static_argnums=(3, 4, 5))
def eventually_forward(x, t_start, t_end, n, bin1, bin_t):
    """Forward of EventuallyLayer.  x: (B, input_dim); t_*: (G,)."""
    B, D = x.shape
    T = bin_t
    assert D % (bin1 * T) == 0
    n_k = D // (bin1 * T)
    Gx = n_k * bin1
    G = Gx * n

    x = x.astype(jnp.float32)
    t_start = t_start.astype(jnp.float32)
    t_end = t_end.astype(jnp.float32)

    # --- glue: regroup x to (B, T, G): u[b, l, g] = x[b, k*bin1*T + l*bin1 + j]
    # (one relayout pass; could be folded into the kernel with strided pl.ds
    #  loads if it ever dominates the profile).
    xg = x.reshape(B, n_k, T, bin1)               # [b, k, l, j]
    xg = jnp.transpose(xg, (0, 2, 1, 3))          # [b, l, k, j]
    xg = xg.reshape(B, T, Gx)                     # [b, l, gx], gx = k*bin1 + j
    if n > 1:
        xg = jnp.repeat(xg, n, axis=-1)           # g = gx*n + num

    # --- glue: per-group weights W[l, g] = sigmoid((l - start_g)*(end_g - l))
    lv = jnp.arange(T, dtype=jnp.float32)[:, None]                       # (T, 1)
    W = jax.nn.sigmoid((lv - t_start[None, :]) * (t_end[None, :] - lv))  # (T, G)

    Bb = _pick_batch_block(B)
    Gb = _pick_lane_block(G)
    grid = (pl.cdiv(B, Bb), pl.cdiv(G, Gb))

    out = pl.pallas_call(
        _eventually_kernel,
        out_shape=jax.ShapeDtypeStruct((B, G), jnp.float32),
        grid_spec=pltpu.PrefetchScalarGridSpec(
            num_scalar_prefetch=0,
            grid=grid,
            in_specs=[
                pl.BlockSpec((Bb, T, Gb), lambda bi, gi: (bi, 0, gi)),
                pl.BlockSpec((T, Gb), lambda bi, gi: (0, gi)),
            ],
            out_specs=pl.BlockSpec((Bb, Gb), lambda bi, gi: (bi, gi)),
        ),
        compiler_params=pltpu.CompilerParams(
            dimension_semantics=("parallel", "parallel")),
    )(xg, W)
    return out


def eventually_reference(x, t_start, t_end, n, bin1, bin_t):
    """Pure-JAX transcription of EventuallyLayer.forward (for verification)."""
    B, D = x.shape
    xn = 1.0 - x
    lv = jnp.arange(bin_t, dtype=jnp.float32)
    outs = []
    for k, i in enumerate(range(0, D, bin1 * bin_t)):
        x_part = xn[:, i:i + bin1 * bin_t]
        for j in range(bin1):
            x_input = x_part[:, j::bin1]                          # (B, T)
            for num in range(n):
                p = k * bin1 * n + j * n + num
                w = jax.nn.sigmoid((lv - t_start[p]) * (t_end[p] - lv))
                X = 1.0 - (1.0 - x_input) * w[None, :]
                prod = -1.0 / (-1.0 + jnp.sum(jnp.log(X), axis=1))
                outs.append(1.0 - prod)
    return jnp.stack(outs, axis=1)                                # (B, G)


if __name__ == "__main__":
    # Small module config: n=2 heads, bin1=2, bin_t=8, 4 chunks -> input_dim=64
    n, bin1, bin_t = 2, 2, 8
    n_k = 4
    input_dim = n_k * bin1 * bin_t                # 64
    B = 8
    G = n * input_dim // bin_t                    # 16 outputs

    key = jax.random.PRNGKey(0)
    kx, ks, ke = jax.random.split(key, 3)

    # Activations in [0, 1) (rule-layer outputs) keep log(1 - u*W) finite.
    x = jax.random.uniform(kx, (B, input_dim), dtype=jnp.float32)
    # Parameter init: (bin_t - 1) * rand(output_dim), as in the module.
    t_start = (bin_t - 1) * jax.random.uniform(ks, (G,), dtype=jnp.float32)
    t_end = (bin_t - 1) * jax.random.uniform(ke, (G,), dtype=jnp.float32)

    out = eventually_forward(x, t_start, t_end, n, bin1, bin_t)
    out = jax.block_until_ready(out)

    ref = eventually_reference(x, t_start, t_end, n, bin1, bin_t)
    assert out.shape == (B, G), out.shape
    assert jnp.allclose(out, ref, rtol=1e-5, atol=1e-5), (out, ref)

    print("KERNEL_OK")
</pallas_src>

<mosaic_0001>
module attributes {stable_mosaic.version = 11 : i64} {
  func.func @_eventually_kernel(%arg0: i32, %arg1: i32, %arg2: memref<8x8x16xf32, #tpu.memory_space<vmem>>, %arg3: memref<8x16xf32, #tpu.memory_space<vmem>>, %arg4: memref<8x16xf32, #tpu.memory_space<vmem>>) attributes {dimension_semantics = [#tpu.dimension_semantics<parallel>, #tpu.dimension_semantics<parallel>], iteration_bounds = array<i64: 1, 1>, scalar_prefetch = 0 : i64, scratch_operands = 0 : i64, tpu.core_type = #tpu.core_type<tc>, window_params = [{transform_indices = @transform_0, window_bounds = array<i64: 8, 8, 16>}, {transform_indices = @transform_1, window_bounds = array<i64: 8, 16>}, {transform_indices = @transform_2, window_bounds = array<i64: 8, 16>}]} {
    %c0 = arith.constant 0 : index
    %c0_0 = arith.constant 0 : index
    %c0_1 = arith.constant 0 : index
    %0 = vector.load %arg2[%c0, %c0_0, %c0_1] : memref<8x8x16xf32, #tpu.memory_space<vmem>>, vector<8x8x16xf32>
    %c0_2 = arith.constant 0 : index
    %c0_3 = arith.constant 0 : index
    %1 = vector.load %arg3[%c0_2, %c0_3] : memref<8x16xf32, #tpu.memory_space<vmem>>, vector<8x16xf32>
    %2 = vector.shape_cast %1 : vector<8x16xf32> to vector<1x8x16xf32>
    %3 = vector.broadcast %2 : vector<1x8x16xf32> to vector<8x8x16xf32>
    %4 = arith.mulf %0, %3 : vector<8x8x16xf32>
    %cst = arith.constant 1.000000e+00 : f32
    %5 = vector.broadcast %cst : f32 to vector<8x8x16xf32>
    %6 = arith.subf %5, %4 : vector<8x8x16xf32>
    %7 = math.log %6 : vector<8x8x16xf32>
    %cst_4 = arith.constant dense<0.000000e+00> : vector<8x16xf32>
    %8 = vector.multi_reduction <add>, %7, %cst_4 [1] : vector<8x8x16xf32> to vector<8x16xf32>
    %cst_5 = arith.constant 1.000000e+00 : f32
    %9 = vector.broadcast %cst_5 : f32 to vector<8x16xf32>
    %10 = arith.subf %8, %9 : vector<8x16xf32>
    %11 = tpu.reciprocal %10 : vector<8x16xf32> -> vector<8x16xf32>
    %cst_6 = arith.constant 1.000000e+00 : f32
    %12 = vector.broadcast %cst_6 : f32 to vector<8x16xf32>
    %13 = arith.addf %12, %11 : vector<8x16xf32>
    %c0_7 = arith.constant 0 : index
    %c0_8 = arith.constant 0 : index
    %14 = vector.load %arg4[%c0_7, %c0_8] : memref<8x16xf32, #tpu.memory_space<vmem>>, vector<8x16xf32>
    tpu.vector_store %arg4[%c0_7, %c0_8], %13 {strides = array<i32>} : memref<8x16xf32, #tpu.memory_space<vmem>>, vector<8x16xf32>,
    return
  }
  func.func @transform_0(%arg0: i32, %arg1: i32) -> (i32, i32, i32) {
    %c0_i32 = arith.constant 0 : i32
    %c0_i32_0 = arith.constant 0 : i32
    return %arg0, %c0_i32, %arg1 : i32, i32, i32
  }
  func.func @transform_1(%arg0: i32, %arg1: i32) -> (i32, i32) {
    %c0_i32 = arith.constant 0 : i32
    %c0_i32_0 = arith.constant 0 : i32
    return %c0_i32, %arg1 : i32, i32
  }
  func.func @transform_2(%arg0: i32, %arg1: i32) -> (i32, i32) {
    %c0_i32 = arith.constant 0 : i32
    return %arg0, %arg1 : i32, i32
  }
}

</mosaic_0001>

<bundles_post_ra>
// kernel: eventually_forward.1
= control target key start
LH: loop header
LB: loop body
LE: loop exit
PB: predicated region body
PF: predicated region fallthrough
CT: control target
= control target key end

     0   :  { %7 = vsyncpa [#allocation3], 0  ;;  %vm53_vm0 = vcmask 130048   ;;  %s549_s0 = inlined_call_operand.vmem [shape: f32[8,8,16], index: 0, kind: input, shape index: {}]   ;;  %s550_s1 = inlined_call_operand.vmem [shape: f32[8,16], index: 1, kind: input, shape index: {}]   ;;  %s551_s2 = inlined_call_operand.hbm [shape: f32[8,16], index: 2, kind: output, shape index: {}]  }
   0x1   :  { %v12_v0 = vld [vmem:[%s549_s0] sm:$0xff]  ;;  %v13_v1 = vld [vmem:[%s549_s0 + $0x8] sm:$0xff]  ;;  %v14_v2 = vld [vmem:[%s549_s0 + $0x10] sm:$0xff]  ;;  %s269_s29 = sshll.u32 %s551_s2, 4  ;;  %s270_s29 = int_to_ptr.hbm [resolvable:$true] %s269_s29 }
   0x2   :  { %v15_v3 = vld [vmem:[%s549_s0 + $0x18] sm:$0xff]  ;;  %v16_v4 = vld [vmem:[%s549_s0 + $0x20] sm:$0xff]  ;;  %v17_v5 = vld [vmem:[%s549_s0 + $0x28] sm:$0xff] }
   0x3   :  { %v18_v6 = vld [vmem:[%s549_s0 + $0x30] sm:$0xff]  ;;  %v20_v7 = vld [vmem:[%s550_s1] sm:$0xff]  ;;  %v19_v8 = vld [vmem:[%s549_s0 + $0x38] sm:$0xff]  ;;  %s345_s0 = smov [#allocation2]  }
   0x4   :  { %v21_v9 = vmul.f32 %v20_v7, %v12_v0  ;;  %v22_v10 = vmul.f32 %v20_v7, %v13_v1  ;;  %v23_v11 = vmul.f32 %v20_v7, %v14_v2  ;;  %v24_v12 = vmul.f32 %v20_v7, %v15_v3  ;;  %s267_s1 = sshll.u32 %s345_s0, 4  ;;  %s268_s1 = int_to_ptr.vmem [resolvable:$true] %s267_s1 }
   0x5   :  { %v25_v13 = vmul.f32 %v20_v7, %v16_v4  ;;  %v26_v14 = vmul.f32 %v20_v7, %v17_v5  ;;  %v27_v15 = vmul.f32 %v20_v7, %v18_v6  ;;  %v28_v19 = vmul.f32 %v20_v7, %v19_v8 }
   0x6   :  { %v29_v16 = vsub.f32 1.0, %v21_v9  ;;  %v30_v17 = vsub.f32 1.0, %v22_v10  ;;  %v31_v18 = vsub.f32 1.0, %v23_v11  ;;  %v32_v20 = vsub.f32 1.0, %v24_v12 }
   0x7   :  { %v33_v21 = vsub.f32 1.0, %v25_v13  ;;  %v34_v22 = vsub.f32 1.0, %v26_v14  ;;  %v35_v23 = vsub.f32 1.0, %v27_v15  ;;  %v36_v24 = vsub.f32 1.0, %v28_v19 }
   0x8   :  { %287 = vlog2.f32 %v29_v16 }
   0x9   :  { %289 = vlog2.f32 %v30_v17 }
   0xa   :  { %291 = vlog2.f32 %v31_v18 }
   0xb   :  { %293 = vlog2.f32 %v32_v20 }
   0xc   :  { %295 = vlog2.f32 %v33_v21 }
   0xd   :  { %297 = vlog2.f32 %v34_v22 }
   0xe   :  { %v288_v25 = vpop.eup %287  ;;  %299 = vlog2.f32 %v35_v23 }
   0xf   :  { %v290_v26 = vpop.eup %289  ;;  %v38_v27 = vmul.f32 0.6931472, %v288_v25  ;;  %301 = vlog2.f32 %v36_v24 }
  0x10   :  { %v292_v28 = vpop.eup %291  ;;  %v40_v29 = vmul.f32 0.6931472, %v290_v26 }
  0x11   :  { %v294_v30 = vpop.eup %293  ;;  %v42_v31 = vmul.f32 0.6931472, %v292_v28  ;;  %v54_v32 = vsel %vm53_vm0, %v38_v27, 0.0 }
  0x12   :  { %v296_v33 = vpop.eup %295  ;;  %v44_v34 = vmul.f32 0.6931472, %v294_v30  ;;  %v55_v35 = vrot.slane %v54_v32, 4  ;;  %v61_v36 = vsel %vm53_vm0, %v40_v29, 0.0 }
  0x13   :  { %v298_v37 = vpop.eup %297  ;;  %v46_v38 = vmul.f32 0.6931472, %v296_v33  ;;  %v62_v39 = vrot.slane %v61_v36, 4  ;;  %v68_v40 = vsel %vm53_vm0, %v42_v31, 0.0 }
  0x14   :  { %v300_v41 = vpop.eup %299  ;;  %v48_v42 = vmul.f32 0.6931472, %v298_v37  ;;  %v56_v43 = vadd.f32 %v55_v35, %v54_v32  ;;  %v69_v44 = vrot.slane %v68_v40, 4  ;;  %v75_v45 = vsel %vm53_vm0, %v44_v34, 0.0 }
  0x15   :  { %v302_v46 = vpop.eup %301  ;;  %v50_v47 = vmul.f32 0.6931472, %v300_v41  ;;  %v63_v48 = vadd.f32 %v62_v39, %v61_v36  ;;  %v76_v49 = vrot.slane %v75_v45, 4  ;;  %v82_v50 = vsel %vm53_vm0, %v46_v38, 0.0 }
  0x16   :  { %v52_v51 = vmul.f32 0.6931472, %v302_v46  ;;  %v57_v52 = vrot.slane %v56_v43, 2  ;;  %v70_v53 = vadd.f32 %v69_v44, %v68_v40  ;;  %v83_v54 = vrot.slane %v82_v50, 4 }
  0x17   :  { %v64_v55 = vrot.slane %v63_v48, 2  ;;  %v77_v56 = vadd.f32 %v76_v49, %v75_v45  ;;  %v89_v57 = vsel %vm53_vm0, %v48_v42, 0.0  ;;  %v96_v58 = vsel %vm53_vm0, %v50_v47, 0.0 }
  0x18   :  { %v58_v59 = vadd.f32 %v57_v52, %v56_v43  ;;  %v71_v60 = vrot.slane %v70_v53, 2  ;;  %v84_v61 = vadd.f32 %v83_v54, %v82_v50  ;;  %v90_v62 = vrot.slane %v89_v57, 4 }
  0x19   :  { %v65_v63 = vadd.f32 %v64_v55, %v63_v48  ;;  %v78_v0 = vrot.slane %v77_v56, 2  ;;  %v97_v1 = vrot.slane %v96_v58, 4  ;;  %v103_v2 = vsel %vm53_vm0, %v52_v51, 0.0 }
  0x1a   :  { %v59_v3 = vrot.slane %v58_v59, 1  ;;  %v72_v4 = vadd.f32 %v71_v60, %v70_v53  ;;  %v85_v5 = vrot.slane %v84_v61, 2  ;;  %v91_v6 = vadd.f32 %v90_v62, %v89_v57 }
  0x1b   :  { %v66_v7 = vrot.slane %v65_v63, 1  ;;  %v79_v8 = vadd.f32 %v78_v0, %v77_v56  ;;  %v98_v9 = vadd.f32 %v97_v1, %v96_v58  ;;  %v104_v10 = vrot.slane %v103_v2, 4 }
  0x1c   :  { %v60_v11 = vadd.f32 %v59_v3, %v58_v59  ;;  %v73_v12 = vrot.slane %v72_v4, 1  ;;  %v86_v13 = vadd.f32 %v85_v5, %v84_v61  ;;  %v92_v14 = vrot.slane %v91_v6, 2 }
  0x1d   :  { %v67_v15 = vadd.f32 %v66_v7, %v65_v63  ;;  %v80_v16 = vrot.slane %v79_v8, 1  ;;  %v99_v17 = vrot.slane %v98_v9, 2  ;;  %v105_v18 = vadd.f32 %v104_v10, %v103_v2 }
  0x1e   :  { %v74_v19 = vadd.f32 %v73_v12, %v72_v4  ;;  %v87_v20 = vrot.slane %v86_v13, 1  ;;  %v93_v21 = vadd.f32 %v92_v14, %v91_v6  ;;  %v278_v22 = vadd.f32 -1.0, %v60_v11 }
  0x1f   :  { %v100_v23 = vadd.f32 %v99_v17, %v98_v9  ;;  %v106_v24 = vrot.slane %v105_v18, 2  ;;  %v279_v25 = vadd.f32 -1.0, %v67_v15  ;;  %v81_v26 = vadd.f32 %v80_v16, %v79_v8 }
  0x20   :  { %v94_v27 = vrot.slane %v93_v21, 1  ;;  %303 = vrcp.f32 %v278_v22  ;;  %v88_v28 = vadd.f32 %v87_v20, %v86_v13  ;;  %v396_v31 = vadd.f32 -1.0, %v74_v19 }
  0x21   :  { %v101_v29 = vrot.slane %v100_v23, 1  ;;  %v107_v30 = vadd.f32 %v106_v24, %v105_v18  ;;  %305 = vrcp.f32 %v279_v25  ;;  %v398_v35 = vadd.f32 -1.0, %v81_v26 }
  0x22   :  { %v95_v32 = vadd.f32 %v94_v27, %v93_v21  ;;  %v127_v36 = vand.u32 2147483647, %v278_v22  ;;  %v129_v37 = vand.u32 2147483648, %v278_v22  ;;  %v400_v39 = vadd.f32 -1.0, %v88_v28 }
  0x23   :  { %v108_v33 = vrot.slane %v107_v30, 1  ;;  %v102_v34 = vadd.f32 %v101_v29, %v100_v23  ;;  %307 = vrcp.f32 %v396_v31  ;;  %vm123_vm1 = vweird.f32 %v278_v22 }
  0x24   :  { %v141_v41 = vand.u32 2147483647, %v279_v25  ;;  %v143_v42 = vand.u32 2147483648, %v279_v25  ;;  %v405_v43 = vadd.f32 -1.0, %v95_v32  ;;  %vm137_vm2 = vweird.f32 %v279_v25 }
  0x25   :  { %v109_v38 = vadd.f32 %v108_v33, %v107_v30  ;;  %v157_v45 = vand.u32 2147483648, %v396_v31  ;;  %v409_v46 = vadd.f32 -1.0, %v102_v34  ;;  %vm411_vm3 = vcmp.eq.f32.partialorder %v127_v36, 8.507059e+37 }
  0x26   :  { %v403_v40 = vpop.eup %303  ;;  %v130_v48 = vor.u32 1.1754944e-38, %v129_v37  ;;  %v155_v49 = vand.u32 2147483647, %v396_v31  ;;  %309 = vrcp.f32 %v398_v35  ;;  %vm151_vm4 = vweird.f32 %v396_v31 }
  0x27   :  { %v119_v44 = vmul.f32 %v403_v40, %v278_v22  ;;  %v306_v50 = vpop.eup %305  ;;  %v417_v51 = vadd.f32 -1.0, %v109_v38  ;;  %311 = vrcp.f32 %v400_v39  ;;  %vm124_vm5 = vweird.f32 %v403_v40 }
  0x28   :  { %v133_v53 = vmul.f32 %v306_v50, %v279_v25  ;;  %vm422_vm6 = vcmp.eq.f32.partialorder %v141_v41, 8.507059e+37  ;;  %v144_v55 = vor.u32 1.1754944e-38, %v143_v42  ;;  %v169_v56 = vand.u32 2147483647, %v398_v35  ;;  %vm440_vm10 = vmor %vm123_vm1, %vm124_vm5 }
  0x29   :  { %v120_v52 = vsub.f32 1.0, %v119_v44  ;;  %v308_v57 = vpop.eup %307  ;;  %v158_v59 = vor.u32 1.1754944e-38, %v157_v45  ;;  %v171_v60 = vand.u32 2147483648, %v398_v35  ;;  %v183_v61 = vand.u32 2147483647, %v400_v39 }
  0x2a   :  { %v134_v62 = vsub.f32 1.0, %v133_v53  ;;  %vm138_vm7 = vweird.f32 %v306_v50  ;;  %v147_v63 = vmul.f32 %v308_v57, %v396_v31  ;;  %vm431_vm8 = vcmp.eq.f32.partialorder %v155_v49, 8.507059e+37 }
  0x2b   :  { %v121_v58 = vmul.f32 %v403_v40, %v120_v52  ;;  %vm165_vm9 = vweird.f32 %v398_v35  ;;  %vm179_vm11 = vweird.f32 %v400_v39  ;;  %v185_v3 = vand.u32 2147483648, %v400_v39  ;;  %vm453_vm14 = vmor %vm137_vm2, %vm138_vm7 }
  0x2c   :  { %313 = vrcp.f32 %v405_v43  ;;  %v310_v4 = vpop.eup %309  ;;  %v135_v5 = vmul.f32 %v306_v50, %v134_v62  ;;  %v148_v6 = vsub.f32 1.0, %v147_v63  ;;  %vm152_vm12 = vweird.f32 %v308_v57 }
  0x2d   :  { %v122_v1 = vadd.f32 %v403_v40, %v121_v58  ;;  %vm447_vm13 = vcmp.eq.f32.partialorder %v169_v56, 8.507059e+37  ;;  %v312_v8 = vpop.eup %311  ;;  %v161_v10 = vmul.f32 %v310_v4, %v398_v35  ;;  %v172_v11 = vor.u32 1.1754944e-38, %v171_v60  ;;  %vm469_vm1 = vmor %vm151_vm4, %vm152_vm12 }
  0x2e   :  { %vm458_vm15 = vcmp.eq.f32.partialorder %v183_v61, 8.507059e+37  ;;  %315 = vrcp.f32 %v409_v46  ;;  %v136_v14 = vadd.f32 %v306_v50, %v135_v5  ;;  %v149_v15 = vmul.f32 %v308_v57, %v148_v6 }
  0x2f   :  { %v126_v13 = vsel %vm440_vm10, %v403_v40, %v122_v1  ;;  %v175_v16 = vmul.f32 %v312_v8, %v400_v39  ;;  %v162_v18 = vsub.f32 1.0, %v161_v10  ;;  %vm166_vm2 = vweird.f32 %v310_v4 }
  0x30   :  { %v186_v19 = vor.u32 1.1754944e-38, %v185_v3  ;;  %vm193_vm5 = vweird.f32 %v405_v43  ;;  %v140_v20 = vsel %vm453_vm14, %v306_v50, %v136_v14  ;;  %v150_v21 = vadd.f32 %v308_v57, %v149_v15  ;;  %vm484_vm4 = vmor %vm165_vm9, %vm166_vm2 }
  0x31   :  { %v176_v22 = vsub.f32 1.0, %v175_v16  ;;  %vm180_vm7 = vweird.f32 %v312_v8  ;;  %v131_v24 = vsel %vm411_vm3, %v130_v48, %v126_v13  ;;  %v163_v25 = vmul.f32 %v310_v4, %v162_v18 }
  0x32   :  { %v314_v23 = vpop.eup %313  ;;  %v197_v26 = vand.u32 2147483647, %v405_v43  ;;  %v199_v27 = vand.u32 2147483648, %v405_v43  ;;  %v154_v28 = vsel %vm469_vm1, %v308_v57, %v150_v21  ;;  %vm207_vm10 = vweird.f32 %v409_v46  ;;  %vm494_vm3 = vmor %vm179_vm11, %vm180_vm7 }
  0x33   :  { %v177_v30 = vmul.f32 %v312_v8, %v176_v22  ;;  %v189_v31 = vmul.f32 %v314_v23, %v405_v43  ;;  %v145_v33 = vsel %vm422_vm6, %v144_v55, %v140_v20  ;;  %v164_v34 = vadd.f32 %v310_v4, %v163_v25 }
  0x34   :  { %v316_v32 = vpop.eup %315  ;;  %v211_v35 = vand.u32 2147483647, %v409_v46  ;;  %v213_v37 = vand.u32 2147483648, %v409_v46  ;;  %vm194_vm9 = vweird.f32 %v314_v23  ;;  %v159_v42 = vsel %vm431_vm8, %v158_v59, %v154_v28 }
  0x35   :  { %v178_v38 = vadd.f32 %v312_v8, %v177_v30  ;;  %v190_v40 = vsub.f32 1.0, %v189_v31  ;;  %v203_v41 = vmul.f32 %v316_v32, %v409_v46  ;;  %v168_v44 = vsel %vm484_vm4, %v310_v4, %v164_v34  ;;  %vm514_vm8 = vmor %vm193_vm5, %vm194_vm9 }
  0x36   :  { %vm208_vm6 = vweird.f32 %v316_v32  ;;  %317 = vrcp.f32 %v417_v51  ;;  %v173_v39 = vsel %vm447_vm13, %v172_v11, %v168_v44  ;;  %vm518_vm11 = vcmp.eq.f32.partialorder %v197_v26, 8.507059e+37 }
  0x37   :  { %v182_v45 = vsel %vm494_vm3, %v312_v8, %v178_v38  ;;  %v191_v47 = vmul.f32 %v314_v23, %v190_v40  ;;  %v204_v48 = vsub.f32 1.0, %v203_v41  ;;  %v200_v53 = vor.u32 1.1754944e-38, %v199_v27  ;;  %vm525_vm12 = vmor %vm207_vm10, %vm208_vm6 }
  0x38   :  { %v187_v49 = vsel %vm458_vm15, %v186_v19, %v182_v45  ;;  %v230_v54 = vadd.f32 1.0, %v131_v24  ;;  %v231_v57 = vadd.f32 1.0, %v145_v33  ;;  %v232_v58 = vadd.f32 1.0, %v159_v42 }
  0x39   :  { %v192_v55 = vadd.f32 %v314_v23, %v191_v47  ;;  %v205_v56 = vmul.f32 %v316_v32, %v204_v48  ;;  %vm529_vm13 = vcmp.eq.f32.partialorder %v211_v35, 8.507059e+37  ;;  %v214_v60 = vor.u32 1.1754944e-38, %v213_v37 }
  0x3a   :  { %v233_v61 = vadd.f32 1.0, %v173_v39  ;;  %vm246_vm14 = vcmask 1041409   ;;  %vm248_vm15 = vcmask 1042434   ;;  %v234_v2 = vadd.f32 1.0, %v187_v49 }
  0x3b   :  { %v196_v62 = vsel %vm514_vm8, %v314_v23, %v192_v55  ;;  %v206_v63 = vadd.f32 %v316_v32, %v205_v56  ;;  %v247_v0 = vsel %vm246_vm14, %v231_v57, %v230_v54  ;;  %vm250_vm1 = vcmask 1043459  }
  0x3c   :  { %v318_v1 = vpop.eup %317  ;;  %v201_v46 = vsel %vm518_vm11, %v200_v53, %v196_v62  ;;  %v249_v3 = vsel %vm248_vm15, %v232_v58, %v247_v0  ;;  %vm252_vm2 = vcmask 1044484   ;;  %vm221_vm5 = vweird.f32 %v417_v51 }
  0x3d   :  { %v210_v4 = vsel %vm525_vm12, %v316_v32, %v206_v63  ;;  %v217_v5 = vmul.f32 %v318_v1, %v417_v51  ;;  %v225_v6 = vand.u32 2147483647, %v417_v51  ;;  %v227_v7 = vand.u32 2147483648, %v417_v51 }
  0x3e   :  { %v251_v8 = vsel %vm250_vm1, %v233_v61, %v249_v3  ;;  %v215_v9 = vsel %vm529_vm13, %v214_v60, %v210_v4  ;;  %vm222_vm7 = vweird.f32 %v318_v1  ;;  %v235_v11 = vadd.f32 1.0, %v201_v46 }
  0x3f   :  { %v218_v10 = vsub.f32 1.0, %v217_v5  ;;  %v253_v12 = vsel %vm252_vm2, %v234_v2, %v251_v8  ;;  %vm254_vm4 = vcmask 1045509   ;;  %vm223_vm10 = vmor %vm221_vm5, %vm222_vm7  ;;  %v228_v14 = vor.u32 1.1754944e-38, %v227_v7 }
  0x40   :  { %v236_v15 = vadd.f32 1.0, %v215_v9  ;;  %vm226_vm3 = vcmp.eq.f32.partialorder %v225_v6, 8.507059e+37  ;;  %v255_v17 = vsel %vm254_vm4, %v235_v11, %v253_v12  ;;  %vm256_vm9 = vcmask 1046534  }
  0x41   :  { %v219_v13 = vmul.f32 %v318_v1, %v218_v10  ;;  %vm258_vm6 = vcmask 1047559  }
  0x42   :  { %v257_v19 = vsel %vm256_vm9, %v236_v15, %v255_v17 }
  0x43   :  { %v220_v16 = vadd.f32 %v318_v1, %v219_v13 }
  0x45   :  { %v224_v18 = vsel %vm223_vm10, %v318_v1, %v220_v16 }
  0x46   :  { %v229_v51 = vsel %vm226_vm3, %v228_v14, %v224_v18 }
  0x47   :  { %v237_v20 = vadd.f32 1.0, %v229_v51 }
  0x49   :  { %v259_v21 = vsel %vm258_vm6, %v237_v20, %v257_v19 }
  0x4a   :  { %261 = vst.msk [vmem:[#allocation2] sm:$0xff] %vm53_vm0, %v259_v21 }
  0x4b   :  { %272 = dma.vmem_to_hbm [thread:$0]  %s268_s1, 128, %s270_s29, [#allocation3]  }
  0x4c   :  { %343 = dma.done.wait [#allocation3], 128  }
  0x4d   :  { %344 = vsyncadd [#allocation3], 4294967168 }
  0x4e   :  { %277 = vsyncpa [#allocation3], 1 }

</bundles_post_ra>
